<compile_context>
chip_gen: v7x
topology: tpu7x:2x2x1
jax: 0.10.0
libtpu: 0.0.40
codegen_flags: <defaults>
</compile_context>

<pallas_src>
import jax
import jax.numpy as jnp
from jax.experimental import pallas as pl
from jax.experimental.pallas import tpu as pltpu

HID_SIZE = 64
SUBLANE = 8            # f32 sublane granularity (batch tile must be a multiple of this)
TB_MAX = 2048          # max batch tile size (multiple of 8; few-MiB VMEM footprint everywhere)
SMALL_BATCH_FALLBACK = 64


def _round_up(n, m):
    return ((n + m - 1) // m) * m


def actor_kernel(x_ref, w1_ref, b1_ref, w2_ref, b2_ref, w3_ref, b3_ref, mu_ref):
    # bf16 MXU inputs, f32 accumulation, f32 bias-add + tanh.
    x = x_ref[...].astype(jnp.bfloat16)
    h1 = jnp.tanh(
        jnp.dot(x, w1_ref[...], preferred_element_type=jnp.float32) + b1_ref[...]
    )
    h2 = jnp.tanh(
        jnp.dot(h1.astype(jnp.bfloat16), w2_ref[...],
                preferred_element_type=jnp.float32) + b2_ref[...]
    )
    mu = jnp.tanh(
        jnp.dot(h2.astype(jnp.bfloat16), w3_ref[...],
                preferred_element_type=jnp.float32) + b3_ref[...]
    )
    mu_ref[...] = mu.astype(mu_ref.dtype)


def prepare_params(params):
    """One-time parameter prep (hoisted out of the per-call wrapper):
    cast matmul weights to bf16, keep biases in f32 as (1, out) rows."""
    return {
        "w1": params["w1"].astype(jnp.bfloat16),
        "w2": params["w2"].astype(jnp.bfloat16),
        "w3": params["w3"].astype(jnp.bfloat16),
        "b1": params["b1"].reshape(1, -1).astype(jnp.float32),
        "b2": params["b2"].reshape(1, -1).astype(jnp.float32),
        "b3": params["b3"].reshape(1, -1).astype(jnp.float32),
    }


def _reference_forward(x, params):
    """Plain-JAX f32 reference (PyTorch-equivalent forward)."""
    hi = jax.lax.Precision.HIGHEST
    h = jnp.tanh(jnp.dot(x, params["w1"], precision=hi) + params["b1"])
    h = jnp.tanh(jnp.dot(h, params["w2"], precision=hi) + params["b2"])
    return jnp.tanh(jnp.dot(h, params["w3"], precision=hi) + params["b3"])


def _fallback_forward(x, pp):
    """Small-batch fused-XLA path; same bf16-matmul / f32-activation math as the kernel."""
    h = jnp.tanh(jnp.dot(x.astype(jnp.bfloat16), pp["w1"],
                         preferred_element_type=jnp.float32) + pp["b1"])
    h = jnp.tanh(jnp.dot(h.astype(jnp.bfloat16), pp["w2"],
                         preferred_element_type=jnp.float32) + pp["b2"])
    return jnp.tanh(jnp.dot(h.astype(jnp.bfloat16), pp["w3"],
                            preferred_element_type=jnp.float32) + pp["b3"])


def model_actor_forward(x, prepared_params, *, force_pallas=False):
    """x: (B, obs_size) float32. prepared_params: output of prepare_params().
    Returns mu: (B, act_size) float32."""
    pp = prepared_params
    w1, b1, w2, b2, w3, b3 = pp["w1"], pp["b1"], pp["w2"], pp["b2"], pp["w3"], pp["b3"]
    B, obs = x.shape
    hid = w1.shape[1]
    act = w3.shape[1]

    # Tiny-batch inference: a standalone pallas_call is pure launch overhead there.
    if (not force_pallas) and B <= SMALL_BATCH_FALLBACK:
        return _fallback_forward(x, pp)

    # Batch tiling: no explicit padding (Pallas masks the ragged last tile). Pick the tile
    # count even when >1 so v7x's two TensorCores get a balanced split.
    n_tiles = max(1, pl.cdiv(B, TB_MAX))
    if n_tiles > 1 and (n_tiles % 2) == 1:
        n_tiles += 1
    tb = _round_up(pl.cdiv(B, n_tiles), SUBLANE)
    grid = (pl.cdiv(B, tb),)

    cost = pl.CostEstimate(
        flops=2 * B * (obs * hid + hid * hid + hid * act),
        transcendentals=B * (hid + hid + act),
        bytes_accessed=(
            4 * (B * obs + B * act + hid + hid + act)       # f32 x, mu, biases
            + 2 * (obs * hid + hid * hid + hid * act)       # bf16 weights
        ),
    )

    # Weights/biases: tiny and invariant across batch tiles -> fully VMEM-resident,
    # not re-DMA'd / double-buffered every grid step.
    weight_spec = pl.BlockSpec(memory_space=pltpu.MemorySpace.VMEM)

    out = pl.pallas_call(
        actor_kernel,
        out_shape=jax.ShapeDtypeStruct((B, act), jnp.float32),
        grid=grid,
        in_specs=[
            pl.BlockSpec((tb, obs), lambda i: (i, 0)),   # x: tiled over batch, pipelined
            weight_spec, weight_spec,                    # w1 (bf16), b1 (f32)
            weight_spec, weight_spec,                    # w2 (bf16), b2 (f32)
            weight_spec, weight_spec,                    # w3 (bf16), b3 (f32)
        ],
        out_specs=pl.BlockSpec((tb, act), lambda i: (i, 0)),
        compiler_params=pltpu.CompilerParams(
            dimension_semantics=("parallel",),           # megacore sharding on v7x
            vmem_limit_bytes=32 << 20,                   # explicit; v5e default is only 16 MiB
        ),
        cost_estimate=cost,
    )(x, w1, b1, w2, b2, w3, b3)

    return out


def init_params(key, obs_size, act_size):
    """Deterministic synthetic init (uniform ~ PyTorch default Linear init scale)."""
    ks = jax.random.split(key, 6)

    def lin(kw, kb, fan_in, fan_out):
        bound = 1.0 / jnp.sqrt(fan_in)
        w = jax.random.uniform(kw, (fan_in, fan_out), jnp.float32, -bound, bound)
        b = jax.random.uniform(kb, (1, fan_out), jnp.float32, -bound, bound)
        return w, b

    w1, b1 = lin(ks[0], ks[1], obs_size, HID_SIZE)
    w2, b2 = lin(ks[2], ks[3], HID_SIZE, HID_SIZE)
    w3, b3 = lin(ks[4], ks[5], HID_SIZE, act_size)
    # log_stdev parameter exists in the module but is unused in forward().
    log_stdev = jnp.zeros((act_size,), jnp.float32)
    return {"w1": w1, "b1": b1, "w2": w2, "b2": b2, "w3": w3, "b3": b3,
            "log_stdev": log_stdev}


if __name__ == "__main__":
    key = jax.random.PRNGKey(0)
    obs_size, act_size = 16, 4

    k_params, k_x1, k_x2 = jax.random.split(key, 3)
    params = init_params(k_params, obs_size, act_size)
    pp = prepare_params(params)   # one-time prep (bf16 weight cast); reused across calls

    # 1) Small-shape check (force the Pallas path so the kernel itself runs).
    x_small = jax.random.normal(k_x1, (2, obs_size), jnp.float32)
    mu_small = jax.block_until_ready(model_actor_forward(x_small, pp, force_pallas=True))
    ref_small = _reference_forward(x_small, params)
    assert mu_small.shape == (2, act_size)
    assert jnp.allclose(mu_small, ref_small, atol=2e-2), "Pallas mismatch (small batch)"

    # 2) Larger batch exercises the tiled, pipelined, megacore-parallel path
    #    (B=2500 -> 2 tiles of 1256 rows, ragged last tile masked by Pallas).
    x_big = jax.random.normal(k_x2, (2500, obs_size), jnp.float32)
    mu_big = jax.block_until_ready(model_actor_forward(x_big, pp))
    ref_big = _reference_forward(x_big, params)
    assert mu_big.shape == (2500, act_size)
    assert jnp.allclose(mu_big, ref_big, atol=2e-2), "Pallas mismatch (tiled batch)"

    print("KERNEL_OK")
</pallas_src>

<mosaic_0001>
module attributes {stable_mosaic.version = 11 : i64} {
  func.func @actor_kernel(%arg0: i32, %arg1: memref<8x16xf32, #tpu.memory_space<vmem>>, %arg2: memref<16x64xbf16, #tpu.memory_space<vmem>>, %arg3: memref<1x64xf32, #tpu.memory_space<vmem>>, %arg4: memref<64x64xbf16, #tpu.memory_space<vmem>>, %arg5: memref<1x64xf32, #tpu.memory_space<vmem>>, %arg6: memref<64x4xbf16, #tpu.memory_space<vmem>>, %arg7: memref<1x4xf32, #tpu.memory_space<vmem>>, %arg8: memref<8x4xf32, #tpu.memory_space<vmem>>) attributes {dimension_semantics = [#tpu.dimension_semantics<parallel>], iteration_bounds = array<i64: 1>, scalar_prefetch = 0 : i64, scratch_operands = 0 : i64, tpu.core_type = #tpu.core_type<tc>, window_params = [{transform_indices = @transform_0, window_bounds = array<i64: 8, 16>}, {pipeline_mode = #tpu.pipeline_mode<synchronous>, transform_indices = @transform_1, window_bounds = array<i64: 16, 64>}, {pipeline_mode = #tpu.pipeline_mode<synchronous>, transform_indices = @transform_2, window_bounds = array<i64: 1, 64>}, {pipeline_mode = #tpu.pipeline_mode<synchronous>, transform_indices = @transform_3, window_bounds = array<i64: 64, 64>}, {pipeline_mode = #tpu.pipeline_mode<synchronous>, transform_indices = @transform_4, window_bounds = array<i64: 1, 64>}, {pipeline_mode = #tpu.pipeline_mode<synchronous>, transform_indices = @transform_5, window_bounds = array<i64: 64, 4>}, {pipeline_mode = #tpu.pipeline_mode<synchronous>, transform_indices = @transform_6, window_bounds = array<i64: 1, 4>}, {transform_indices = @transform_7, window_bounds = array<i64: 8, 4>}]} {
    %c0 = arith.constant 0 : index
    %c0_0 = arith.constant 0 : index
    %0 = vector.load %arg1[%c0, %c0_0] : memref<8x16xf32, #tpu.memory_space<vmem>>, vector<8x16xf32>
    %1 = arith.truncf %0 : vector<8x16xf32> to vector<8x16xbf16>
    %c0_1 = arith.constant 0 : index
    %c0_2 = arith.constant 0 : index
    %2 = vector.load %arg2[%c0_1, %c0_2] : memref<16x64xbf16, #tpu.memory_space<vmem>>, vector<16x64xbf16>
    %cst = arith.constant dense<0.000000e+00> : vector<8x64xf32>
    %3 = tpu.matmul %1, %2, %cst {dimension_numbers = #tpu.dot_dimension_numbers<[1], [0], [0], [1], [0, 0, 1, 1], [], []>} : vector<8x16xbf16>, vector<16x64xbf16>, vector<8x64xf32> -> vector<8x64xf32>
    %c0_3 = arith.constant 0 : index
    %c0_4 = arith.constant 0 : index
    %4 = vector.load %arg3[%c0_3, %c0_4] : memref<1x64xf32, #tpu.memory_space<vmem>>, vector<1x64xf32>
    %5 = vector.broadcast %4 : vector<1x64xf32> to vector<8x64xf32>
    %6 = arith.addf %3, %5 : vector<8x64xf32>
    %7 = math.tanh %6 : vector<8x64xf32>
    %8 = arith.truncf %7 : vector<8x64xf32> to vector<8x64xbf16>
    %c0_5 = arith.constant 0 : index
    %c0_6 = arith.constant 0 : index
    %9 = vector.load %arg4[%c0_5, %c0_6] : memref<64x64xbf16, #tpu.memory_space<vmem>>, vector<64x64xbf16>
    %cst_7 = arith.constant dense<0.000000e+00> : vector<8x64xf32>
    %10 = tpu.matmul %8, %9, %cst_7 {dimension_numbers = #tpu.dot_dimension_numbers<[1], [0], [0], [1], [0, 0, 1, 1], [], []>} : vector<8x64xbf16>, vector<64x64xbf16>, vector<8x64xf32> -> vector<8x64xf32>
    %c0_8 = arith.constant 0 : index
    %c0_9 = arith.constant 0 : index
    %11 = vector.load %arg5[%c0_8, %c0_9] : memref<1x64xf32, #tpu.memory_space<vmem>>, vector<1x64xf32>
    %12 = vector.broadcast %11 : vector<1x64xf32> to vector<8x64xf32>
    %13 = arith.addf %10, %12 : vector<8x64xf32>
    %14 = math.tanh %13 : vector<8x64xf32>
    %15 = arith.truncf %14 : vector<8x64xf32> to vector<8x64xbf16>
    %c0_10 = arith.constant 0 : index
    %c0_11 = arith.constant 0 : index
    %16 = vector.load %arg6[%c0_10, %c0_11] : memref<64x4xbf16, #tpu.memory_space<vmem>>, vector<64x4xbf16>
    %cst_12 = arith.constant dense<0.000000e+00> : vector<8x4xf32>
    %17 = tpu.matmul %15, %16, %cst_12 {dimension_numbers = #tpu.dot_dimension_numbers<[1], [0], [0], [1], [0, 0, 1, 1], [], []>} : vector<8x64xbf16>, vector<64x4xbf16>, vector<8x4xf32> -> vector<8x4xf32>
    %c0_13 = arith.constant 0 : index
    %c0_14 = arith.constant 0 : index
    %18 = vector.load %arg7[%c0_13, %c0_14] : memref<1x4xf32, #tpu.memory_space<vmem>>, vector<1x4xf32>
    %19 = vector.broadcast %18 : vector<1x4xf32> to vector<8x4xf32>
    %20 = arith.addf %17, %19 : vector<8x4xf32>
    %21 = math.tanh %20 : vector<8x4xf32>
    %c0_15 = arith.constant 0 : index
    %c0_16 = arith.constant 0 : index
    %22 = vector.load %arg8[%c0_15, %c0_16] : memref<8x4xf32, #tpu.memory_space<vmem>>, vector<8x4xf32>
    tpu.vector_store %arg8[%c0_15, %c0_16], %21 {strides = array<i32>} : memref<8x4xf32, #tpu.memory_space<vmem>>, vector<8x4xf32>,
    return
  }
  func.func @transform_0(%arg0: i32) -> (i32, i32) {
    %c0_i32 = arith.constant 0 : i32
    %c0_i32_0 = arith.constant 0 : i32
    return %arg0, %c0_i32 : i32, i32
  }
  func.func @transform_1(%arg0: i32) -> (i32, i32) {
    %c0_i32 = arith.constant 0 : i32
    %c0_i32_0 = arith.constant 0 : i32
    %c0_i32_1 = arith.constant 0 : i32
    return %c0_i32, %c0_i32_0 : i32, i32
  }
  func.func @transform_2(%arg0: i32) -> (i32, i32) {
    %c0_i32 = arith.constant 0 : i32
    %c0_i32_0 = arith.constant 0 : i32
    %c0_i32_1 = arith.constant 0 : i32
    return %c0_i32, %c0_i32_0 : i32, i32
  }
  func.func @transform_3(%arg0: i32) -> (i32, i32) {
    %c0_i32 = arith.constant 0 : i32
    %c0_i32_0 = arith.constant 0 : i32
    %c0_i32_1 = arith.constant 0 : i32
    return %c0_i32, %c0_i32_0 : i32, i32
  }
  func.func @transform_4(%arg0: i32) -> (i32, i32) {
    %c0_i32 = arith.constant 0 : i32
    %c0_i32_0 = arith.constant 0 : i32
    %c0_i32_1 = arith.constant 0 : i32
    return %c0_i32, %c0_i32_0 : i32, i32
  }
  func.func @transform_5(%arg0: i32) -> (i32, i32) {
    %c0_i32 = arith.constant 0 : i32
    %c0_i32_0 = arith.constant 0 : i32
    %c0_i32_1 = arith.constant 0 : i32
    return %c0_i32, %c0_i32_0 : i32, i32
  }
  func.func @transform_6(%arg0: i32) -> (i32, i32) {
    %c0_i32 = arith.constant 0 : i32
    %c0_i32_0 = arith.constant 0 : i32
    %c0_i32_1 = arith.constant 0 : i32
    return %c0_i32, %c0_i32_0 : i32, i32
  }
  func.func @transform_7(%arg0: i32) -> (i32, i32) {
    %c0_i32 = arith.constant 0 : i32
    %c0_i32_0 = arith.constant 0 : i32
    return %arg0, %c0_i32 : i32, i32
  }
}

</mosaic_0001>

<bundles_post_ra>
// kernel: tpu_custom_call.1
= control target key start
LH: loop header
LB: loop body
LE: loop exit
PB: predicated region body
PF: predicated region fallthrough
CT: control target
= control target key end

     0   :  { %12 = vsyncpa [#allocation3], 0  ;;  %v378_v1 = vmov 0.0   ;;  %vm379_vm0 = vmmov 0   ;;  %vm45_vm1 = vcmask 130048   ;;  %vm130_vm2 = vcmask 523264   ;;  %s476_s0 = inlined_call_operand.vmem [shape: f32[2,16], index: 0, kind: input, shape index: {}]   ;;  %s477_s1 = inlined_call_operand.vmem [shape: bf16[16,64], index: 1, kind: input, shape index: {}]   ;;  %s478_s2 = inlined_call_operand.vmem [shape: f32[1,64], index: 2, kind: input, shape index: {}]   ;;  %s479_s3 = inlined_call_operand.vmem [shape: bf16[64,64], index: 3, kind: input, shape index: {}]   ;;  %s480_s4 = inlined_call_operand.vmem [shape: f32[1,64], index: 4, kind: input, shape index: {}]   ;;  %s481_s5 = inlined_call_operand.vmem [shape: bf16[64,4], index: 5, kind: input, shape index: {}]   ;;  %s482_s6 = inlined_call_operand.vmem [shape: f32[1,4], index: 6, kind: input, shape index: {}]   ;;  %s483_s7 = inlined_call_operand.hbm [shape: f32[2,4], index: 7, kind: output, shape index: {}]  }
   0x1   :  { %v339_v0 = vld [vmem:[%s477_s1] sm:$0xff]   ;;  %304 = vmatprep.subr.bf16.mxu0 %v378_v1  ;;  %310 = vmatprep.subr.bf16.mxu1 %v378_v1  ;;  %v341_v5 = vld [vmem:[%s479_s3 + $0x8] sm:$0xff]   ;;  %v342_v6 = vld [vmem:[%s479_s3 + $0x10] sm:$0xff]   ;;  %vm259_vm3 = vcmask 31744  }
   0x2   :  { %v28_v2 = vld [vmem:[%s476_s0] sm:$0xff]  ;;  %305 = vmatpush3.bf16.msra.mxu0 %v339_v0  ;;  %306 = vmatprep.mubr.msk.bf16.mxu0 %vm379_vm0, %v378_v1  ;;  %v343_v7 = vld [vmem:[%s479_s3 + $0x18] sm:$0xff]   ;;  %v345_v17 = vld [vmem:[%s481_s5 + $0x8] sm:$0xff]  }
   0x3   :  { %v29_v3 = vpack.c.bf16 %v28_v2, %v28_v2  ;;  %318 = vmatprep.mubr.msk.bf16.mxu1 %vm379_vm0, %v378_v1  ;;  %322 = vmatprep.subr.bf16.mxu0 %v378_v1  ;;  %v340_v4 = vld [vmem:[%s479_s3] sm:$0xff]   ;;  %v346_v18 = vld [vmem:[%s481_s5 + $0x10] sm:$0xff]   ;;  %v347_v19 = vld [vmem:[%s481_s5 + $0x18] sm:$0xff]  }
   0x4   :  { %311 = vmatpush3.bf16.msra.mxu1 %v340_v4  ;;  %v277_v8 = vld [vmem:[%s478_s2] ss:$0 sm:$0xff] }
   0x5   :  { %307 = vmatmul.mubr.msk.bf16.vlgmr.msra.gmra.mrb[0].mxu0 %vm45_vm1, %v29_v3  ;;  %312 = vmatprep.subr.bf16.mxu1 %v378_v1  ;;  %v344_v16 = vld [vmem:[%s481_s5] sm:$0xff]  }
   0x6   :  { %330 = vmatprep.mubr.msk.bf16.mxu0 %vm379_vm0, %v378_v1  ;;  %323 = vmatpush3.bf16.msra.mxu0 %v344_v16  ;;  %v280_v20 = vld [vmem:[%s480_s4] ss:$0 sm:$0xff] }
   0x7   :  { %324 = vmatprep.subr.bf16.mxu0 %v378_v1  ;;  %v286_v28 = vld [vmem:[%s482_s6] ss:$0 sm:$0xff] }
   0x8   :  { %313 = vmatpush3.bf16.msra.mxu1 %v341_v5 }
   0x9   :  { %314 = vmatprep.subr.bf16.mxu1 %v378_v1 }
   0xa   :  { %325 = vmatpush3.bf16.msra.mxu0 %v345_v17 }
   0xb   :  { %326 = vmatprep.subr.bf16.mxu0 %v378_v1 }
   0xc   :  { %315 = vmatpush3.bf16.msra.mxu1 %v342_v6 }
   0xd   :  { %316 = vmatprep.subr.bf16.mxu1 %v378_v1 }
   0xe   :  { %327 = vmatpush3.bf16.msra.mxu0 %v346_v18 }
   0xf   :  { %328 = vmatprep.subr.bf16.mxu0 %v378_v1 }
  0x10   :  { %317 = vmatpush3.bf16.msra.mxu1 %v343_v7 }
  0x12   :  { %329 = vmatpush3.bf16.msra.mxu0 %v347_v19 }
  0xd8   :  { %v83_v9 = vpop.f32.mrb[0].mxu0 }
  0xd9   :  { %v84_v10 = vadd.f32 %v277_v8, %v83_v9  ;;  %v308_v11 = vpop.f32.mrb[1].mxu0 }
  0xda   :  { %v86_v12 = vpop.f32.mrb[2].mxu0 }
  0xdb   :  { %348 = vtanh.f32 %v84_v10  ;;  %v309_v13 = vpop.f32.mrb[3].mxu0 }
  0xe5   :  { %v349_v14 = vpop.eup %348 }
  0xe6   :  { %v90_v15 = vpack.c.bf16 %v349_v14, %v349_v14 }
  0xe8   :  { %319 = vmatmul.mubr.msk.bf16.vlgmr.msra.gmra.mrb[0].mxu1 %vm130_vm2, %v90_v15 }
 0x1bb   :  { %v168_v21 = vpop.f32.mrb[0].mxu1 }
 0x1bc   :  { %v169_v22 = vadd.f32 %v280_v20, %v168_v21  ;;  %v320_v23 = vpop.f32.mrb[1].mxu1 }
 0x1bd   :  { %v171_v24 = vpop.f32.mrb[2].mxu1 }
 0x1be   :  { %350 = vtanh.f32 %v169_v22  ;;  %v321_v25 = vpop.f32.mrb[3].mxu1 }
 0x1c8   :  { %v351_v26 = vpop.eup %350 }
 0x1c9   :  { %v175_v27 = vpack.c.bf16 %v351_v26, %v351_v26 }
 0x1cb   :  { %331 = vmatmul.mubr.msk.bf16.vlgmr.msra.gmra.mrb[4].mxu0 %vm130_vm2, %v175_v27 }
 0x29e   :  { %v252_v29 = vpop.f32.mrb[4].mxu0 }
 0x29f   :  { %v253_v30 = vadd.f32 %v286_v28, %v252_v29  ;;  %v332_v31 = vpop.f32.mrb[5].mxu0 }
 0x2a0   :  { %v255_v32 = vpop.f32.mrb[6].mxu0 }
 0x2a1   :  { %352 = vtanh.f32 %v253_v30  ;;  %v333_v33 = vpop.f32.mrb[7].mxu0 }
 0x2ab   :  { %v353_v34 = vpop.eup %352 }
 0x2ac   :  { %260 = vst.msk [vmem:[#allocation2] sm:$0xff] %vm259_vm3, %v353_v34 }
 0x2ad   :  { %265 = vsyncadd [#allocation3], 96  ;;  %s380_s4 = smov [#allocation2]  }
 0x2ae   :  { %s266_s5 = sshll.u32 %s380_s4, 4  ;;  %s267_s5 = int_to_ptr.vmem [resolvable:$true] %s266_s5 }
 0x2af   :  { %s354_s23 = scalar_lea.vmem %s267_s5, 32  ;;  %s358_s24 = scalar_lea.vmem %s267_s5, 128 }
 0x2b0   :  { %p355_p0 = scmp.ne.s32.totalorder %s267_s5, %s354_s23  ;;  %p359_p1 = scmp.lt.s32.totalorder %s267_s5, %s267_s5 }
 0x2b1   :  { %p360_p2 = scmp.lt.s32.totalorder %s358_s24, %s354_s23 }
 0x2b3   :  { %p361_p3 = por %p360_p2, %p359_p1 }
 0x2b5   :  { %p362_p4 = pnand %p361_p3, %p355_p0 }
 0x2b7   :  { %365 = shalt.err (!%p362_p4)
}
 0x2b8   :  { %s366_s26 = scalar_lea.hbm %s483_s7, 32 }
 0x2b9   :  { %p367_p5 = scmp.ne.s32.totalorder %s483_s7, %s366_s26  ;;  %p370_p6 = scmp.lt.u32.totalorder %s366_s26, %s483_s7 }
 0x2bb   :  { %p372_p7 = pnand %p370_p6, %p367_p5 }
 0x2bd   :  { %375 = shalt.err (!%p372_p7)
}
 0x2be   :  { %s381_s30 = smov 32   ;;  %s382_s0 = smov 2  }
 0x2bf   :  { %272 = dma.vmem_to_hbm [thread:$0]  %s267_s5, 32, %s483_s7, [#allocation3], %s381_s30, %s381_s30, %s382_s0  }
 0x2c0   :  { %376 = dma.done.wait [#allocation3], 128  }
 0x2c1   :  { %377 = vsyncadd [#allocation3], 4294967168 }
 0x2c2   :  { %276 = vsyncpa [#allocation3], 1 }

</bundles_post_ra>
